<compile_context>
chip_gen: v7x
topology: tpu7x:2x2x1
jax: 0.10.0
libtpu: 0.0.40
codegen_flags: <defaults>
</compile_context>

<pallas_src>
import jax
import jax.numpy as jnp
from jax.experimental import pallas as pl
from jax.experimental.pallas import tpu as pltpu


_VMEM_LIMIT = 32 * 1024 * 1024    # explicit scoped-VMEM limit (portable v5e/v6e/v7x)
_VMEM_BUDGET = 20 * 1024 * 1024   # what block buffers + in-kernel temps may use


def _round_up(x, m):
    return (x + m - 1) // m * m


def _lane_pad(n):
    # VMEM pads the minor dim to 128 lanes (f32).
    return max(128, _round_up(n, 128))


def _fm_kernel(bias_ref, x_ref, v_ref, w_ref, s_ref, o_ref):
    # bias_ref: SMEM (1,)     scalar bias
    # x_ref:    VMEM (TB, D)  streamed batch tile (double-buffered by Pallas)
    # v_ref:    VMEM (D, K)   factor matrix, resident across the grid
    # w_ref:    VMEM (1, D)   linear weights (row layout), resident
    # s_ref:    VMEM (1, D)   0.5 * rowsum(V^2), resident
    # o_ref:    VMEM (TB, 1)  per-row FM output
    x = x_ref[...]

    # MXU: factor interactions.
    q = jnp.dot(x, v_ref[...], preferred_element_type=jnp.float32)      # (TB, K)
    half_sq = 0.5 * jnp.sum(q * q, axis=1, keepdims=True)               # (TB, 1)

    # VPU + XLU: linear term and collapsed sum_square in one pass:
    #   x.w - 0.5 * x^2 . rowsum(V^2) = sum_d x * (w - x * s_half)
    rest = jnp.sum(x * (w_ref[...] - x * s_ref[...]), axis=1, keepdims=True)  # (TB, 1)

    o_ref[...] = (bias_ref[0] + half_sq + rest).astype(o_ref.dtype)


def _auto_block_b(B, D, K):
    """Pick the batch tile from lane-padded VMEM accounting + slab targets."""
    # Per-row padded bytes (f32): x double-buffer, (tb,1) output double-buffer
    # (padded to 128 lanes), q + its square, ~3 element-wise temps of x width.
    bytes_per_row = 4 * (2 * _lane_pad(D)     # x double-buffer
                         + 2 * 128            # (tb, 1) out double-buffer
                         + 2 * _lane_pad(K)   # q + q*q
                         + 3 * _lane_pad(D))  # element-wise temps
    cap_vmem = max(8, (_VMEM_BUDGET // bytes_per_row) // 8 * 8)
    # Keep the logical x slab <= 2 MiB (HBM-bound sweet spot).
    cap_slab = max(8, (2 * 1024 * 1024) // (D * 4) // 8 * 8)
    # Keep >= ~8 grid steps when B is large (v7x megacore + pipeline overlap),
    # but never shrink the slab below ~512 KiB just to create steps.
    min_slab_rows = max(8, ((512 * 1024) // (D * 4)) // 8 * 8)
    cap_steps = max(min_slab_rows, _round_up(pl.cdiv(B, 8), 8))
    return max(8, min(cap_vmem, cap_slab, cap_steps))


def fm_forward(x, bias, weights, V, *, block_b=None):
    """Pallas FM forward.

    Args:
      x:       (B, D) float32
      bias:    (1,)   float32
      weights: (D,)   float32
      V:       (D, K) float32
      block_b: optional batch-tile override (rounded down to a multiple of 8).

    Returns:
      (B,) float32
    """
    B, D = x.shape
    K = V.shape[1]

    x = x.astype(jnp.float32)
    Vf = V.astype(jnp.float32)
    w_row = weights.astype(jnp.float32).reshape(1, D)
    s_half = (0.5 * jnp.sum(Vf * Vf, axis=1)).reshape(1, D)
    bias = bias.astype(jnp.float32)

    if block_b is None:
        tb = _auto_block_b(B, D, K)
    else:
        tb = max(8, (block_b // 8) * 8)
    if tb >= B:
        tb = B  # single full-extent block (exempt from the multiple-of-8 rule)

    # Last block may be partial: garbage input rows only affect their own
    # (dropped) output rows; OOB output rows are masked on writeback.
    num_tiles = pl.cdiv(B, tb)

    cost = pl.CostEstimate(
        flops=2 * B * D * K + 5 * B * D,
        transcendentals=0,
        bytes_accessed=4 * (B * D + D * K + 2 * D + B),
    )

    out = pl.pallas_call(
        _fm_kernel,
        out_shape=jax.ShapeDtypeStruct((B, 1), jnp.float32),
        grid_spec=pltpu.PrefetchScalarGridSpec(
            num_scalar_prefetch=0,
            grid=(num_tiles,),
            in_specs=[
                pl.BlockSpec(memory_space=pltpu.SMEM),       # bias (1,)
                pl.BlockSpec((tb, D), lambda i: (i, 0)),     # x (streamed)
                pl.BlockSpec((D, K), lambda i: (0, 0)),      # V (resident)
                pl.BlockSpec((1, D), lambda i: (0, 0)),      # w row (resident)
                pl.BlockSpec((1, D), lambda i: (0, 0)),      # 0.5*rowsum(V^2)
            ],
            out_specs=pl.BlockSpec((tb, 1), lambda i: (i, 0)),
        ),
        compiler_params=pltpu.CompilerParams(
            dimension_semantics=("parallel",),
            vmem_limit_bytes=_VMEM_LIMIT,
        ),
        cost_estimate=cost,
    )(bias, x, Vf, w_row, s_half)
    return out[:, 0]


def fm_reference(x, bias, weights, V):
    q = x @ V
    linear_term = x @ weights
    square_sum = jnp.sum(q ** 2, axis=1)
    sum_square = jnp.sum((x ** 2) @ (V ** 2), axis=1)
    return bias[0] + linear_term + 0.5 * (square_sum - sum_square)


if __name__ == "__main__":
    # Deterministic synthetic parameters (SecondOrderFactorizationMachine shapes).
    dim_input = 32     # d
    num_factors = 8    # k

    key = jax.random.PRNGKey(0)
    kx, kw, kb, kv = jax.random.split(key, 4)

    # nn.Linear(dim_input, 1): weight (1, d) flattened to (d,), bias (1,).
    bound = 1.0 / jnp.sqrt(jnp.float32(dim_input))
    weights = jax.random.uniform(kw, (dim_input,), minval=-bound, maxval=bound,
                                 dtype=jnp.float32)
    bias = jax.random.uniform(kb, (1,), minval=-bound, maxval=bound,
                              dtype=jnp.float32)
    # self.V = torch.randn(d, k) * 0.01
    V = jax.random.normal(kv, (dim_input, num_factors), dtype=jnp.float32) * 0.01

    # (batch, forced block_b): None -> auto tiling (single full block for small B);
    # (100, 32) exercises multi-tile grid with a partial (non-divisible) last block.
    cases = [(8, None), (10, None), (100, 32)]
    for batch, blk in cases:
        xb = jax.random.normal(jax.random.fold_in(kx, batch),
                               (batch, dim_input), dtype=jnp.float32)
        out = jax.block_until_ready(fm_forward(xb, bias, weights, V, block_b=blk))
        ref = fm_reference(xb, bias, weights, V)
        assert out.shape == (batch,)
        assert jnp.allclose(out, ref, atol=1e-5, rtol=1e-5), (batch, out, ref)

    print("KERNEL_OK")
</pallas_src>

<mosaic_0001>
module attributes {stable_mosaic.version = 11 : i64} {
  func.func @_fm_kernel(%arg0: i32, %arg1: memref<1xf32, #tpu.memory_space<smem>>, %arg2: memref<8x32xf32, #tpu.memory_space<vmem>>, %arg3: memref<32x8xf32, #tpu.memory_space<vmem>>, %arg4: memref<1x32xf32, #tpu.memory_space<vmem>>, %arg5: memref<1x32xf32, #tpu.memory_space<vmem>>, %arg6: memref<8x1xf32, #tpu.memory_space<vmem>>) attributes {dimension_semantics = [#tpu.dimension_semantics<parallel>], iteration_bounds = array<i64: 1>, scalar_prefetch = 0 : i64, scratch_operands = 0 : i64, tpu.core_type = #tpu.core_type<tc>, window_params = [{transform_indices = @transform_0, window_bounds = array<i64: 1>}, {transform_indices = @transform_1, window_bounds = array<i64: 8, 32>}, {pipeline_mode = #tpu.pipeline_mode<synchronous>, transform_indices = @transform_2, window_bounds = array<i64: 32, 8>}, {pipeline_mode = #tpu.pipeline_mode<synchronous>, transform_indices = @transform_3, window_bounds = array<i64: 1, 32>}, {pipeline_mode = #tpu.pipeline_mode<synchronous>, transform_indices = @transform_4, window_bounds = array<i64: 1, 32>}, {transform_indices = @transform_5, window_bounds = array<i64: 8, 1>}]} {
    %c0 = arith.constant 0 : index
    %c0_0 = arith.constant 0 : index
    %0 = vector.load %arg2[%c0, %c0_0] : memref<8x32xf32, #tpu.memory_space<vmem>>, vector<8x32xf32>
    %c0_1 = arith.constant 0 : index
    %c0_2 = arith.constant 0 : index
    %1 = vector.load %arg3[%c0_1, %c0_2] : memref<32x8xf32, #tpu.memory_space<vmem>>, vector<32x8xf32>
    %cst = arith.constant dense<0.000000e+00> : vector<8x8xf32>
    %2 = tpu.matmul %0, %1, %cst {dimension_numbers = #tpu.dot_dimension_numbers<[1], [0], [0], [1], [0, 0, 1, 1], [], []>} : vector<8x32xf32>, vector<32x8xf32>, vector<8x8xf32> -> vector<8x8xf32>
    %3 = arith.mulf %2, %2 : vector<8x8xf32>
    %cst_3 = arith.constant dense<0.000000e+00> : vector<8xf32>
    %4 = vector.multi_reduction <add>, %3, %cst_3 [1] : vector<8x8xf32> to vector<8xf32>
    %5 = vector.shape_cast %4 : vector<8xf32> to vector<8x1xf32>
    %cst_4 = arith.constant 5.000000e-01 : f32
    %6 = vector.broadcast %cst_4 : f32 to vector<8x1xf32>
    %7 = arith.mulf %6, %5 : vector<8x1xf32>
    %c0_5 = arith.constant 0 : index
    %c0_6 = arith.constant 0 : index
    %8 = vector.load %arg4[%c0_5, %c0_6] : memref<1x32xf32, #tpu.memory_space<vmem>>, vector<1x32xf32>
    %c0_7 = arith.constant 0 : index
    %c0_8 = arith.constant 0 : index
    %9 = vector.load %arg5[%c0_7, %c0_8] : memref<1x32xf32, #tpu.memory_space<vmem>>, vector<1x32xf32>
    %10 = vector.broadcast %9 : vector<1x32xf32> to vector<8x32xf32>
    %11 = arith.mulf %0, %10 : vector<8x32xf32>
    %12 = vector.broadcast %8 : vector<1x32xf32> to vector<8x32xf32>
    %13 = arith.subf %12, %11 : vector<8x32xf32>
    %14 = arith.mulf %0, %13 : vector<8x32xf32>
    %cst_9 = arith.constant dense<0.000000e+00> : vector<8xf32>
    %15 = vector.multi_reduction <add>, %14, %cst_9 [1] : vector<8x32xf32> to vector<8xf32>
    %16 = vector.shape_cast %15 : vector<8xf32> to vector<8x1xf32>
    %c0_10 = arith.constant 0 : index
    %17 = memref.load %arg1[%c0_10] : memref<1xf32, #tpu.memory_space<smem>>
    %18 = vector.broadcast %17 : f32 to vector<8x1xf32>
    %19 = arith.addf %18, %7 : vector<8x1xf32>
    %20 = arith.addf %19, %16 : vector<8x1xf32>
    %c0_11 = arith.constant 0 : index
    %c0_12 = arith.constant 0 : index
    %21 = vector.load %arg6[%c0_11, %c0_12] : memref<8x1xf32, #tpu.memory_space<vmem>>, vector<8x1xf32>
    tpu.vector_store %arg6[%c0_11, %c0_12], %20 {strides = array<i32>} : memref<8x1xf32, #tpu.memory_space<vmem>>, vector<8x1xf32>,
    return
  }
  func.func @transform_0(%arg0: i32) -> i32 {
    %c0_i32 = arith.constant 0 : i32
    %c0_i32_0 = arith.constant 0 : i32
    return %c0_i32 : i32
  }
  func.func @transform_1(%arg0: i32) -> (i32, i32) {
    %c0_i32 = arith.constant 0 : i32
    %c0_i32_0 = arith.constant 0 : i32
    return %arg0, %c0_i32 : i32, i32
  }
  func.func @transform_2(%arg0: i32) -> (i32, i32) {
    %c0_i32 = arith.constant 0 : i32
    %c0_i32_0 = arith.constant 0 : i32
    %c0_i32_1 = arith.constant 0 : i32
    return %c0_i32, %c0_i32_0 : i32, i32
  }
  func.func @transform_3(%arg0: i32) -> (i32, i32) {
    %c0_i32 = arith.constant 0 : i32
    %c0_i32_0 = arith.constant 0 : i32
    %c0_i32_1 = arith.constant 0 : i32
    return %c0_i32, %c0_i32_0 : i32, i32
  }
  func.func @transform_4(%arg0: i32) -> (i32, i32) {
    %c0_i32 = arith.constant 0 : i32
    %c0_i32_0 = arith.constant 0 : i32
    %c0_i32_1 = arith.constant 0 : i32
    return %c0_i32, %c0_i32_0 : i32, i32
  }
  func.func @transform_5(%arg0: i32) -> (i32, i32) {
    %c0_i32 = arith.constant 0 : i32
    %c0_i32_0 = arith.constant 0 : i32
    return %arg0, %c0_i32 : i32, i32
  }
}

</mosaic_0001>

<bundles_post_ra>
// kernel: tpu_custom_call.1
= control target key start
LH: loop header
LB: loop body
LE: loop exit
PB: predicated region body
PF: predicated region fallthrough
CT: control target
= control target key end

     0   :  { %v164_v0 = vmov 0.0|0.0   ;;  %vm165_vm0 = vmmov 0   ;;  %v166_v4 = vmov 0.0   ;;  %vm26_vm1 = vcmask 261120   ;;  %s224_s2 = inlined_call_operand.vmem [shape: f32[32,8], index: 2, kind: input, shape index: {}]   ;;  %s225_s1 = inlined_call_operand.vmem [shape: f32[8,32], index: 1, kind: input, shape index: {}]   ;;  %s226_s4 = inlined_call_operand.vmem [shape: f32[1,32], index: 4, kind: input, shape index: {}]   ;;  %s227_s3 = inlined_call_operand.vmem [shape: f32[1,32], index: 3, kind: input, shape index: {}]   ;;  %s228_s0 = inlined_call_operand.<no memory space> [shape: f32[1], index: 0, kind: input, shape index: {}]   ;;  %s229_s5 = inlined_call_operand.vmem [shape: f32[8,1], index: 5, kind: output, shape index: {}]  }
   0x1   :  { %155 = vmatprep.subr.bf16.mxu0 %v164_v0  ;;  %v22_v1 = vld [vmem:[%s224_s2] sm:$0xff]  ;;  %v23_v2 = vld [vmem:[%s224_s2 + $0x8] sm:$0xff]  ;;  %v24_v3 = vld [vmem:[%s224_s2 + $0x10] sm:$0xff]  ;;  %152 = vmatprep.mubr.msk.f32.mxu0 %vm165_vm0, %v166_v4  ;;  %vm101_vm2 = vcmask 64512   ;;  %v127_v20 = vstv %s228_s0  ;;  %vm130_vm3 = vcmask 7168  }
   0x2   :  { %v156_v5 = vpack.c.bf16 %v23_v2, %v22_v1  ;;  %v25_v6 = vld [vmem:[%s224_s2 + $0x18] sm:$0xff]  ;;  %v21_v8 = vld [vmem:[%s225_s1] sm:$0xff] }
   0x3   :  { %v159_v7 = vpack.c.bf16 %v25_v6, %v24_v3  ;;  %v137_v9 = vld [vmem:[%s226_s4] ss:$0 sm:$0xff] }
   0x4   :  { %157 = vmatpush3.bf16.msra.mxu0 %v156_v5  ;;  %v114_v10 = vmul.f32 %v137_v9, %v21_v8  ;;  %v138_v11 = vld [vmem:[%s227_s3] ss:$0 sm:$0xff] }
   0x5   :  { %158 = vmatprep.subr.bf16.mxu0 %v164_v0 }
   0x6   :  { %v121_v12 = vsub.f32 %v138_v11, %v114_v10 }
   0x8   :  { %160 = vmatpush3.bf16.msra.mxu0 %v159_v7  ;;  %v122_v16 = vmul.f32 %v121_v12, %v21_v8 }
   0xa   :  { %v123_v18 = vsel %vm26_vm1, %v122_v16, 0.0 }
   0xb   :  { %153 = vmatmul.mubr.msk.f32.vlgmr.msra.gmra.mrb[0].mxu0 %vm26_vm1, %v21_v8 }
  0xde   :  { %v96_v13 = vpop.f32.mrb[0].mxu0 }
  0xdf   :  { %v100_v14 = vmul.f32 %v96_v13, %v96_v13  ;;  %v154_v15 = vpop.f32.mrb[1].mxu0 }
  0xe1   :  { %v102_v17 = vsel %vm101_vm2, %v100_v14, 0.0 }
  0xe2   :  { %103 = vadd.xlane.f32.xlu0 %v102_v17 }
  0xe6   :  { %124 = vadd.xlane.f32.xlu0 %v123_v18 }
 0x16f   :  { %v104_v19 = vpop.xlane.xlu0 %103 }
 0x170   :  { %v105_v21 = vmul.f32 0.5, %v104_v19 }
 0x172   :  { %v128_v22 = vadd.f32 %v127_v20, %v105_v21 }
 0x173   :  { %v125_v23 = vpop.xlane.xlu0 %124 }
 0x174   :  { %v129_v24 = vadd.f32 %v128_v22, %v125_v23 }
 0x176   :  { %131 = vst.msk [vmem:[%s229_s5] sm:$0xff] %vm130_vm3, %v129_v24 }

</bundles_post_ra>
